<compile_context>
chip_gen: v5e
topology: v5e:2x2
jax: 0.10.0
libtpu: 0.0.40
codegen_flags: <defaults>
</compile_context>

<pallas_src>
import functools

import jax
import jax.numpy as jnp
from jax.experimental import pallas as pl
from jax.experimental.pallas import tpu as pltpu

THRESH = 0.5
TAU = 0.25
GAMMA = 1.0  # only affects the surrogate backward pass, not the forward
# TODO(synk): ZIF surrogate gradient (backward) is not implemented; forward only.


def _lif_first_step_kernel(x_ref, spike_ref, mem_ref, *, thresh):
    # Fresh module state: self.mem == 0, so mem*tau + x == x.
    x = x_ref[...]
    fired = x >= thresh                              # == (x - thresh >= 0)
    spike_ref[...] = fired.astype(spike_ref.dtype)
    mem_ref[...] = jnp.where(fired, 0.0, x)          # hard reset


def _lif_step_kernel(x_ref, mem_ref, spike_ref, new_mem_ref, *, thresh, tau):
    m = mem_ref[...] * tau + x_ref[...]
    fired = m >= thresh                              # == (m - thresh >= 0)
    spike_ref[...] = fired.astype(spike_ref.dtype)
    new_mem_ref[...] = jnp.where(fired, 0.0, m)      # == (1 - spike) * m


def _choose_tiling(total):
    """Pick (rows, lanes, pad, block_rows) for a lane-dense 2D slab."""
    lanes = None
    pad = 0
    for cand in (2048, 1024, 512, 256, 128):
        if total % cand == 0:
            lanes = cand
            break
    if lanes is None:
        # Irregular size: pad the flat array up to a multiple of 128 lanes.
        lanes = 128
        padded = -(-total // lanes) * lanes
        pad = padded - total
    rows = (total + pad) // lanes

    # Cap each array's tile at ~1 MiB of f32: with <=4 double-buffered streams
    # that is <=8 MiB of VMEM, comfortably inside the default scoped limit on
    # v5e/v6e/v7x while still large enough to sit near the HBM roofline.
    max_rows = max(8, (1 << 20) // (lanes * 4))
    if rows <= max_rows:
        block_rows = rows            # whole slab is one (small) block
    else:
        block_rows = None
        for d in range(8, max_rows + 1, 8):   # largest mult-of-8 divisor
            if rows % d == 0:
                block_rows = d
        if block_rows is None:
            block_rows = rows        # pathological row count: one big block
    return rows, lanes, pad, block_rows


def lif_spike(x, mem=None, *, thresh=THRESH, tau=TAU, spike_dtype=jnp.float32):
    """One LIFSpike forward step. Returns (spike, new_mem), same shape as x.

    spike_dtype can be set to jnp.bfloat16 (0.0/1.0 are exact) to halve the
    spike output HBM stream if the consumer accepts it.
    """
    orig_shape = x.shape
    x = x.astype(jnp.float32)
    total = x.size
    rows, lanes, pad, block_rows = _choose_tiling(total)
    num_blocks = rows // block_rows

    def to_2d(a):
        flat = a.reshape(-1)
        if pad:
            flat = jnp.pad(flat, (0, pad))
        return flat.reshape(rows, lanes)

    x2d = to_2d(x)
    spec = pl.BlockSpec((block_rows, lanes), lambda i: (i, 0))
    out_shape = (
        jax.ShapeDtypeStruct((rows, lanes), spike_dtype),
        jax.ShapeDtypeStruct((rows, lanes), jnp.float32),
    )
    compiler_params = pltpu.CompilerParams(dimension_semantics=("parallel",))

    if mem is None:
        # Skip the (all-zero) membrane input stream entirely.
        spike2d, new_mem2d = pl.pallas_call(
            functools.partial(_lif_first_step_kernel, thresh=thresh),
            grid=(num_blocks,),
            in_specs=[spec],
            out_specs=(spec, spec),
            out_shape=out_shape,
            compiler_params=compiler_params,
        )(x2d)
    else:
        mem2d = to_2d(mem.astype(jnp.float32))
        spike2d, new_mem2d = pl.pallas_call(
            functools.partial(_lif_step_kernel, thresh=thresh, tau=tau),
            grid=(num_blocks,),
            in_specs=[spec, spec],
            out_specs=(spec, spec),
            out_shape=out_shape,
            # In-place membrane update: mem input buffer reused for new_mem.
            input_output_aliases={1: 1},
            compiler_params=compiler_params,
        )(x2d, mem2d)

    spike = spike2d.reshape(-1)[:total].reshape(orig_shape)
    new_mem = new_mem2d.reshape(-1)[:total].reshape(orig_shape)
    return spike, new_mem


def _ref_lif(x, mem, thresh=THRESH, tau=TAU):
    m = mem * tau + x
    spike = (m - thresh >= 0).astype(jnp.float32)
    new_mem = (1.0 - spike) * m
    return spike, new_mem


if __name__ == "__main__":
    key = jax.random.PRNGKey(0)
    # Small NCHW input consistent with the conv pipeline this module sits in.
    x = jax.random.normal(key, (2, 4, 16, 16), dtype=jnp.float32)

    # Step 1: fresh module (self.mem = 0).
    spike, new_mem = lif_spike(x)
    jax.block_until_ready(spike)
    jax.block_until_ready(new_mem)
    ref_spike, ref_mem = _ref_lif(x, jnp.zeros_like(x))
    assert jnp.array_equal(spike, ref_spike)
    assert jnp.allclose(new_mem, ref_mem)

    # Step 2: stateful call with the membrane from step 1.
    x2 = jax.random.normal(jax.random.PRNGKey(1), (2, 4, 16, 16), dtype=jnp.float32)
    spike2, new_mem2 = lif_spike(x2, new_mem)
    jax.block_until_ready(spike2)
    jax.block_until_ready(new_mem2)
    ref_spike2, ref_mem2 = _ref_lif(x2, ref_mem)
    assert jnp.array_equal(spike2, ref_spike2)
    assert jnp.allclose(new_mem2, ref_mem2)

    print("KERNEL_OK")
</pallas_src>

<mosaic_0001>
module attributes {stable_mosaic.version = 11 : i64} {
  func.func @_lif_first_step_kernel(%arg0: i32, %arg1: memref<1x2048xf32, #tpu.memory_space<vmem>>, %arg2: memref<1x2048xf32, #tpu.memory_space<vmem>>, %arg3: memref<1x2048xf32, #tpu.memory_space<vmem>>) attributes {dimension_semantics = [#tpu.dimension_semantics<parallel>], iteration_bounds = array<i64: 1>, scalar_prefetch = 0 : i64, scratch_operands = 0 : i64, tpu.core_type = #tpu.core_type<tc>, window_params = [{transform_indices = @transform_0, window_bounds = array<i64: 1, 2048>}, {transform_indices = @transform_1, window_bounds = array<i64: 1, 2048>}, {transform_indices = @transform_2, window_bounds = array<i64: 1, 2048>}]} {
    %c0 = arith.constant 0 : index
    %c0_0 = arith.constant 0 : index
    %0 = vector.load %arg1[%c0, %c0_0] : memref<1x2048xf32, #tpu.memory_space<vmem>>, vector<1x2048xf32>
    %cst = arith.constant 5.000000e-01 : f32
    %1 = vector.broadcast %cst : f32 to vector<1x2048xf32>
    %2 = arith.cmpf oge, %0, %1 : vector<1x2048xf32>
    %3 = arith.extui %2 : vector<1x2048xi1> to vector<1x2048xi32>
    %4 = arith.sitofp %3 : vector<1x2048xi32> to vector<1x2048xf32>
    %c0_1 = arith.constant 0 : index
    %c0_2 = arith.constant 0 : index
    %5 = vector.load %arg2[%c0_1, %c0_2] : memref<1x2048xf32, #tpu.memory_space<vmem>>, vector<1x2048xf32>
    tpu.vector_store %arg2[%c0_1, %c0_2], %4 {strides = array<i32>} : memref<1x2048xf32, #tpu.memory_space<vmem>>, vector<1x2048xf32>,
    %cst_3 = arith.constant 0.000000e+00 : f32
    %6 = vector.broadcast %cst_3 : f32 to vector<1x2048xf32>
    %7 = arith.select %2, %6, %0 : vector<1x2048xi1>, vector<1x2048xf32>
    %c0_4 = arith.constant 0 : index
    %c0_5 = arith.constant 0 : index
    %8 = vector.load %arg3[%c0_4, %c0_5] : memref<1x2048xf32, #tpu.memory_space<vmem>>, vector<1x2048xf32>
    tpu.vector_store %arg3[%c0_4, %c0_5], %7 {strides = array<i32>} : memref<1x2048xf32, #tpu.memory_space<vmem>>, vector<1x2048xf32>,
    return
  }
  func.func @transform_0(%arg0: i32) -> (i32, i32) {
    %c0_i32 = arith.constant 0 : i32
    %c0_i32_0 = arith.constant 0 : i32
    return %arg0, %c0_i32 : i32, i32
  }
  func.func @transform_1(%arg0: i32) -> (i32, i32) {
    %c0_i32 = arith.constant 0 : i32
    %c0_i32_0 = arith.constant 0 : i32
    return %arg0, %c0_i32 : i32, i32
  }
  func.func @transform_2(%arg0: i32) -> (i32, i32) {
    %c0_i32 = arith.constant 0 : i32
    %c0_i32_0 = arith.constant 0 : i32
    return %arg0, %c0_i32 : i32, i32
  }
}

</mosaic_0001>

<bundles_post_ra>
// kernel: tpu_custom_call.1
= control target key start
LH: loop header
LB: loop body
LE: loop exit
PB: predicated region body
PF: predicated region fallthrough
CT: control target
= control target key end

     0   :  { %8 = vsyncpa [#allocation3], 0  ;;  %s185_s0 = inlined_call_operand.hbm [shape: f32[1,2048], index: 0, kind: input, shape index: {}]   ;;  %s186_s1 = inlined_call_operand.hbm [shape: f32[1,2048], index: 1, kind: output, shape index: {0}]   ;;  %s187_s2 = inlined_call_operand.hbm [shape: f32[1,2048], index: 2, kind: output, shape index: {1}]  }
   0x1   :  { %9 = vsyncpa [#allocation4], 0 }
   0x2   :  { %10 = vsyncpa [#allocation7], 0  ;;  %s16_s11 = sshll.u32 %s185_s0, 4  ;;  %s157_s12 = smov [#allocation2]   ;;  %s17_s11 = int_to_ptr.hbm [resolvable:$true] %s16_s11 }
   0x3   :  { %s18_s13 = sshll.u32 %s157_s12, 4  ;;  %s19_s13 = int_to_ptr.vmem [resolvable:$true] %s18_s13 }
   0x4   :  { %21 = dma.hbm_to_vmem [thread:$0]  %s17_s11, 256, %s19_s13, [#allocation3]  }
   0x5   :  { %151 = dma.done.wait [#allocation3], 256  }
   0x6   :  { %152 = vsyncadd [#allocation3], 4294967040  ;;  %s158_s14 = smov [#allocation5]   ;;  %s47_s18 = sshll.u32 %s186_s1, 4  ;;  %v26_v0 = vld [vmem:[#allocation2] sm:$0xff]  ;;  %v27_v1 = vld [vmem:[#allocation2 + $0x8] sm:$0xff]  ;;  %s48_s18 = int_to_ptr.hbm [resolvable:$true] %s47_s18 }
   0x7   :  { %s45_s15 = sshll.u32 %s158_s14, 4  ;;  %vm28_vm0 = vcmp.ge.f32.partialorder %v26_v0, 0.5  ;;  %vm29_vm1 = vcmp.ge.f32.partialorder %v27_v1, 0.5  ;;  %s159_s19 = smov [#allocation6]   ;;  %v160_v2 = vmov 0.0   ;;  %s46_s15 = int_to_ptr.vmem [resolvable:$true] %s45_s15 }
   0x8   :  { %s56_s20 = sshll.u32 %s159_s19, 4  ;;  %s58_s22 = sshll.u32 %s187_s2, 4  ;;  %v73_v3 = vsel %vm28_vm0, 1.0, %v160_v2  ;;  %v74_v4 = vsel %vm29_vm1, 1.0, %v160_v2  ;;  %v36_v5 = vsel %vm28_vm0, 0.0, %v26_v0  ;;  %v37_v6 = vsel %vm29_vm1, 0.0, %v27_v1  ;;  %s57_s20 = int_to_ptr.vmem [resolvable:$true] %s56_s20  ;;  %s59_s22 = int_to_ptr.hbm [resolvable:$true] %s58_s22 }
   0x9   :  { %34 = vst [vmem:[#allocation5] sm:$0xff] %v73_v3 }
   0xa   :  { %35 = vst [vmem:[#allocation5 + $0x8] sm:$0xff] %v74_v4 }
   0xb   :  { %38 = vst [vmem:[#allocation6] sm:$0xff] %v36_v5  ;;  %50 = dma.vmem_to_hbm [thread:$0]  %s46_s15, 256, %s48_s18, [#allocation4]  }
   0xc   :  { %39 = vst [vmem:[#allocation6 + $0x8] sm:$0xff] %v37_v6 }
   0xd   :  { %61 = dma.vmem_to_hbm [thread:$0]  %s57_s20, 256, %s59_s22, [#allocation7]  }
   0xe   :  { %153 = dma.done.wait [#allocation4], 256  }
   0xf   :  { %154 = vsyncadd [#allocation4], 4294967040 }
  0x10   :  { %155 = dma.done.wait [#allocation7], 256  }
  0x11   :  { %156 = vsyncadd [#allocation7], 4294967040 }
  0x12   :  { %70 = vsyncpa [#allocation3], 1 }
  0x13   :  { %71 = vsyncpa [#allocation4], 1 }
  0x14   :  { %72 = vsyncpa [#allocation7], 1 }

</bundles_post_ra>
